<compile_context>
chip_gen: v7x
topology: tpu7x:2x2x1
jax: 0.10.0
libtpu: 0.0.40
codegen_flags: <defaults>
</compile_context>

<pallas_src>
import functools

import jax
import jax.numpy as jnp
from jax import lax
from jax.experimental import pallas as pl
from jax.experimental.pallas import tpu as pltpu

_LANE = 128
_SUBLANE = 8
_TARGET_STEP_BYTES = 4 * 1024 * 1024     # HBM bytes per grid step (all inputs)
_MAX_WORKING_SET = 24 * 1024 * 1024      # double-buffered input tiles, v7x-safe
_VMEM_LIMIT = 32 * 1024 * 1024           # <= scoped/physical VMEM on all generations
_SMALL_INPUT_BYTES = 128 * 1024          # below this: plain-JAX fast path
_MAX_FULL_COLS = 2048                    # variance: widest full-F lane block before F-tiling


def _prod(shape):
    r = 1
    for s in shape:
        r *= int(s)
    return r


def _round_up(x, m):
    return ((x + m - 1) // m) * m


def _cdiv(a, b):
    return (a + b - 1) // b


def _choose_row_tile(total_rows, vmem_bytes_per_row):
    """Rows per grid step: ~_TARGET_STEP_BYTES of traffic per step, double-
    buffered working set <= _MAX_WORKING_SET, and (when possible) >= 2 grid
    steps so v7x megacore can shard the parallel grid across both TCs.
    Returns a multiple of 8 whenever total_rows > 8."""
    if total_rows <= _SUBLANE:
        return max(total_rows, 1)
    budget = _MAX_WORKING_SET // max(2 * vmem_bytes_per_row, 1)   # 2 = double buffer
    target = _TARGET_STEP_BYTES // max(vmem_bytes_per_row, 1)
    rows = max(_SUBLANE, (min(budget, target) // _SUBLANE) * _SUBLANE)
    rows = min(rows, (total_rows // _SUBLANE) * _SUBLANE)
    if _cdiv(total_rows, rows) < 2:                               # prefer >= 2 steps
        half = _round_up((total_rows + 1) // 2, _SUBLANE)
        rows = max(_SUBLANE, min(rows, half))
    return rows


def _pick_mse_cols(e):
    """Largest lane width in [128, 1024] dividing e -> zero-copy 2-D view.
    Prefer multiples of 128; fall back to any divisor; else pad-to-128."""
    for c in (1024, 896, 768, 640, 512, 384, 256, 128):
        if e % c == 0:
            return c, False
    for c in range(1024, _LANE - 1, -1):
        if e % c == 0:
            return c, False
    return _LANE, True


# ------------------------- kernels (per row-block) --------------------------


def _sse_partial_kernel(p_ref, t_ref, sse_ref, *, tile_rows, valid_rows):
    """Partial sum of squared error for one lane-dense (tile_rows, C) block."""
    d = p_ref[...].astype(jnp.float32) - t_ref[...].astype(jnp.float32)
    rid = lax.broadcasted_iota(jnp.int32, d.shape, 0) + pl.program_id(0) * tile_rows
    d = jnp.where(rid < valid_rows, d, 0.0)          # mask ragged last row-block
    sse_ref[...] = jnp.sum(d * d, axis=0, keepdims=True)[None]


def _var_partial_kernel(x_ref, sum_ref, m2_ref, *, tile_rows, tile_cols,
                        total_rows, total_cols):
    """Per-column (sum, M2) partials of one (tile_rows, tile_cols) block
    (Chan / parallel-variance form; combined exactly in the wrapper)."""
    i = pl.program_id(0)
    j = pl.program_id(1)
    x = x_ref[...].astype(jnp.float32)
    rid = lax.broadcasted_iota(jnp.int32, x.shape, 0) + i * tile_rows
    cid = lax.broadcasted_iota(jnp.int32, x.shape, 1) + j * tile_cols
    valid = (rid < total_rows) & (cid < total_cols)
    x = jnp.where(valid, x, 0.0)
    n_valid = jnp.minimum(tile_rows, total_rows - i * tile_rows).astype(jnp.float32)
    s = jnp.sum(x, axis=0, keepdims=True)             # per-column block sum
    mean_b = s / n_valid                               # block mean
    d = jnp.where(valid, x - mean_b, 0.0)
    sum_ref[...] = s[None]
    m2_ref[...] = jnp.sum(d * d, axis=0, keepdims=True)[None]


# ----------------------------- loss functions --------------------------------


def _mse_plain(pred, target):
    d = pred.astype(jnp.float32) - target.astype(jnp.float32)
    return jnp.mean(d * d)


def mse_loss_pallas(pred, target):
    """mean((pred - target)**2) over all elements (torch.nn.MSELoss default)."""
    assert pred.shape == target.shape, (pred.shape, target.shape)
    e = _prod(pred.shape)
    in_bytes = e * (pred.dtype.itemsize + target.dtype.itemsize)
    if in_bytes < _SMALL_INPUT_BYTES or e < 16 * _LANE:
        return _mse_plain(pred, target)                # tiny: launch not worth it

    p1 = pred.reshape(-1)                              # free reshape (contiguous)
    t1 = target.reshape(-1)                            # native dtype; upcast in-kernel
    cols, need_pad = _pick_mse_cols(e)
    e_pad = _round_up(e, cols) if need_pad else e
    if need_pad:
        # TODO(synk): handle the <128-element ragged tail in-kernel to avoid this
        # one extra HBM copy; identical zero padding on both sides keeps SSE exact.
        p1 = jnp.pad(p1, (0, e_pad - e))
        t1 = jnp.pad(t1, (0, e_pad - e))
    rows_total = e_pad // cols
    if rows_total < 2 * _SUBLANE:
        return _mse_plain(pred, target)
    p2 = p1.reshape(rows_total, cols)
    t2 = t1.reshape(rows_total, cols)

    vmem_row_bytes = _round_up(cols, _LANE) * (pred.dtype.itemsize
                                               + target.dtype.itemsize)
    tile_rows = _choose_row_tile(rows_total, vmem_row_bytes)
    num_blocks = _cdiv(rows_total, tile_rows)

    kernel = functools.partial(_sse_partial_kernel,
                               tile_rows=tile_rows, valid_rows=rows_total)
    cost = pl.CostEstimate(
        flops=3 * e, transcendentals=0,
        bytes_accessed=(e * pred.dtype.itemsize + e * target.dtype.itemsize
                        + num_blocks * cols * 4))
    sse = pl.pallas_call(
        kernel,
        out_shape=jax.ShapeDtypeStruct((num_blocks, 1, cols), jnp.float32),
        grid=(num_blocks,),
        in_specs=[pl.BlockSpec((tile_rows, cols), lambda i: (i, 0)),
                  pl.BlockSpec((tile_rows, cols), lambda i: (i, 0))],
        out_specs=pl.BlockSpec((1, 1, cols), lambda i: (i, 0, 0)),
        compiler_params=pltpu.CompilerParams(
            dimension_semantics=("parallel",),
            vmem_limit_bytes=_VMEM_LIMIT),
        cost_estimate=cost,
    )(p2, t2)
    return jnp.sum(sse) / e                            # divide by true element count


def get_variance_loss_pallas(x, loss_weight=1.0):
    """loss_weight * mean(var(x, dim=0)) with torch's unbiased (N-1) variance.

    Single HBM pass: each (tile_rows, tile_cols) block emits per-column
    (sum, M2) f32 partials; the wrapper combines them with the Chan
    parallel-variance formula (numerically close to the exact two-pass)."""
    n = int(x.shape[0])
    f = _prod(x.shape[1:]) if x.ndim > 1 else 1
    f = max(f, 1)
    total_bytes = n * f * x.dtype.itemsize
    if total_bytes < _SMALL_INPUT_BYTES or n < 2 * _SUBLANE:
        x32 = x.reshape(n, f).astype(jnp.float32)
        # n == 1 -> NaN, matching torch.var(unbiased=True).
        return loss_weight * jnp.mean(jnp.var(x32, axis=0, ddof=1))

    x2 = x.reshape(n, f)
    # TODO(synk): for very small F (1-3 columns) fold rows into lanes and extend
    # the Chan combine across folds to recover full lane density.
    tile_cols = f if f <= _MAX_FULL_COLS else 512
    num_fb = _cdiv(f, tile_cols)
    out_cols = num_fb * tile_cols
    vmem_row_bytes = _round_up(tile_cols, _LANE) * x.dtype.itemsize
    tile_rows = _choose_row_tile(n, vmem_row_bytes)
    num_nb = _cdiv(n, tile_rows)

    kernel = functools.partial(_var_partial_kernel, tile_rows=tile_rows,
                               tile_cols=tile_cols, total_rows=n, total_cols=f)
    cost = pl.CostEstimate(
        flops=6 * n * f, transcendentals=0,
        bytes_accessed=n * f * x.dtype.itemsize + 2 * num_nb * out_cols * 4)
    sums, m2s = pl.pallas_call(
        kernel,
        out_shape=(jax.ShapeDtypeStruct((num_nb, 1, out_cols), jnp.float32),
                   jax.ShapeDtypeStruct((num_nb, 1, out_cols), jnp.float32)),
        grid=(num_nb, num_fb),
        in_specs=[pl.BlockSpec((tile_rows, tile_cols), lambda i, j: (i, j))],
        out_specs=(pl.BlockSpec((1, 1, tile_cols), lambda i, j: (i, 0, j)),
                   pl.BlockSpec((1, 1, tile_cols), lambda i, j: (i, 0, j))),
        compiler_params=pltpu.CompilerParams(
            dimension_semantics=("parallel", "parallel"),
            vmem_limit_bytes=_VMEM_LIMIT),
        cost_estimate=cost,
    )(x2)

    # Tiny Chan combine in the wrapper epilogue (padded columns contribute 0).
    sums = sums.reshape(num_nb, out_cols)
    m2s = m2s.reshape(num_nb, out_cols)
    n_b = jnp.minimum(tile_rows, n - jnp.arange(num_nb) * tile_rows)
    n_b = n_b.astype(jnp.float32)[:, None]
    col_mean = jnp.sum(sums, axis=0, keepdims=True) / n
    mean_b = sums / n_b
    total_ssd = jnp.sum(m2s + n_b * (mean_b - col_mean) ** 2)
    # n == 1 -> (n-1) == 0 -> inf/NaN, matching torch.var(unbiased=True).
    return total_ssd * loss_weight / ((n - 1) * f)


# ------------------------------ module mirrors ------------------------------


class GetLoss:
    """JAX/Pallas mirror of cace.tasks.loss.GetLoss (dicts in, scalar out)."""

    def __init__(self, target_name, predict_name=None, output_index=None,
                 name=None, loss_fn=None, loss_weight=1.0):
        self.target_name = target_name
        self.predict_name = predict_name or target_name
        self.output_index = output_index
        self.name = name or target_name
        self.loss_fn = loss_fn
        self.loss_weight = loss_weight

    def forward(self, pred, target=None, loss_args=None, per_atom=False):
        if self.loss_weight == 0 or self.loss_fn is None:
            return 0.0
        if callable(self.loss_weight):
            loss_weight = (self.loss_weight() if loss_args is None
                           else self.loss_weight(**loss_args))
        else:
            loss_weight = self.loss_weight

        p = pred[self.predict_name]
        if self.output_index is not None:
            p = p[..., self.output_index]

        if target is not None:
            t = target[self.target_name]
        elif self.predict_name != self.target_name:
            t = pred[self.target_name]
        else:
            raise ValueError("Target is None and predict_name is not equal to target_name")

        if per_atom:
            # Data-dependent index plumbing; kept as plain-JAX glue.
            n_atoms = jnp.bincount(target["batch"], length=p.shape[0]).astype(p.dtype)
            p = p / n_atoms
            t = t / n_atoms

        return loss_weight * self.loss_fn(p, t)

    __call__ = forward

    def __repr__(self):
        return (f"{self.__class__.__name__}(name={self.name}, "
                f"loss_fn={self.loss_fn}, loss_weight={self.loss_weight})")


class GetVarianceLoss:
    """Variance-regularization variant:
    loss_weight * mean(var(pred[target_name], dim=0, unbiased))."""

    def __init__(self, target_name, loss_weight=1.0, name=None):
        self.target_name = target_name
        self.loss_weight = loss_weight
        self.name = name

    def __call__(self, pred, *args):
        return get_variance_loss_pallas(pred[self.target_name], self.loss_weight)


if __name__ == "__main__":
    key = jax.random.PRNGKey(0)
    k1, k2, k3, k4, k5 = jax.random.split(key, 5)

    # 1) GetLoss + Pallas MSE, tiny input -> plain-JAX fast path.
    p_small = jax.random.normal(k1, (8, 4, 32), dtype=jnp.float32)
    t_small = jax.random.normal(k2, (8, 4, 32), dtype=jnp.float32)
    loss_mod = GetLoss(target_name="energy", loss_fn=mse_loss_pallas, loss_weight=0.7)
    out = jax.block_until_ready(loss_mod({"energy": p_small}, {"energy": t_small}))
    ref = 0.7 * jnp.mean((p_small - t_small) ** 2)
    assert jnp.allclose(out, ref, rtol=1e-5, atol=1e-6), (out, ref)

    # zero-weight / missing-loss_fn fast returns
    assert GetLoss("energy", loss_fn=mse_loss_pallas, loss_weight=0.0)(
        {"energy": p_small}, {"energy": t_small}) == 0.0
    assert GetLoss("energy")({"energy": p_small}, {"energy": t_small}) == 0.0

    # 2) forces-style MSE through the Pallas kernel (E % 1024 == 0, zero-copy path).
    pf = jax.random.normal(k3, (16384, 3), dtype=jnp.float32)
    tf = pf + 0.05 * jax.random.normal(k4, (16384, 3), dtype=jnp.float32)
    force_mod = GetLoss(target_name="forces", loss_fn=mse_loss_pallas, loss_weight=1000.0)
    out_f = jax.block_until_ready(force_mod({"forces": pf}, {"forces": tf}))
    ref_f = 1000.0 * jnp.mean((pf - tf) ** 2)
    assert jnp.allclose(out_f, ref_f, rtol=1e-4, atol=1e-6), (out_f, ref_f)

    # 3) mixed dtype (bf16 pred, f32 target) + ragged row count (masked last block).
    pb = jax.random.normal(k4, (16383, 3), dtype=jnp.bfloat16)
    tb = jax.random.normal(k5, (16383, 3), dtype=jnp.float32)
    out_m = jax.block_until_ready(mse_loss_pallas(pb, tb))
    ref_m = jnp.mean((pb.astype(jnp.float32) - tb) ** 2)
    assert jnp.allclose(out_m, ref_m, rtol=1e-4, atol=1e-5), (out_m, ref_m)

    # 4) variance-regularization loss through the Pallas kernel (N-tiled, Chan combine).
    xv = 3.0 + jax.random.normal(k5, (4096, 150), dtype=jnp.float32)
    var_mod = GetVarianceLoss(target_name="q", loss_weight=2.5)
    out_v = jax.block_until_ready(var_mod({"q": xv}))
    ref_v = 2.5 * jnp.mean(jnp.var(xv, axis=0, ddof=1))
    assert jnp.allclose(out_v, ref_v, rtol=1e-4, atol=1e-6), (out_v, ref_v)

    # 5) small variance input -> fast path.
    xs = jax.random.normal(k1, (8, 5, 30), dtype=jnp.float32)
    out_vs = jax.block_until_ready(get_variance_loss_pallas(xs, 1.5))
    ref_vs = 1.5 * jnp.mean(jnp.var(xs.reshape(8, -1), axis=0, ddof=1))
    assert jnp.allclose(out_vs, ref_vs, rtol=1e-5, atol=1e-6), (out_vs, ref_vs)

    # 6) callable loss_weight.
    cw_mod = GetLoss("energy", loss_fn=mse_loss_pallas, loss_weight=lambda: 2.0)
    out_c = jax.block_until_ready(cw_mod({"energy": p_small}, {"energy": t_small}))
    assert jnp.allclose(out_c, 2.0 * jnp.mean((p_small - t_small) ** 2), rtol=1e-5)

    print("KERNEL_OK")
</pallas_src>

<mosaic_0001>
module attributes {stable_mosaic.version = 11 : i64} {
  func.func @_sse_partial_kernel(%arg0: i32, %arg1: memref<24x1024xf32, #tpu.memory_space<vmem>>, %arg2: memref<24x1024xf32, #tpu.memory_space<vmem>>, %arg3: memref<1x1x1024xf32, #tpu.memory_space<vmem>>) attributes {dimension_semantics = [#tpu.dimension_semantics<parallel>], iteration_bounds = array<i64: 2>, scalar_prefetch = 0 : i64, scratch_operands = 0 : i64, tpu.core_type = #tpu.core_type<tc>, window_params = [{transform_indices = @transform_0, window_bounds = array<i64: 24, 1024>}, {transform_indices = @transform_1, window_bounds = array<i64: 24, 1024>}, {transform_indices = @transform_2, window_bounds = array<i64: 1, 1, 1024>}]} {
    %c0 = arith.constant 0 : index
    %c0_0 = arith.constant 0 : index
    %0 = vector.load %arg1[%c0, %c0_0] : memref<24x1024xf32, #tpu.memory_space<vmem>>, vector<24x1024xf32>
    %c0_1 = arith.constant 0 : index
    %c0_2 = arith.constant 0 : index
    %1 = vector.load %arg2[%c0_1, %c0_2] : memref<24x1024xf32, #tpu.memory_space<vmem>>, vector<24x1024xf32>
    %2 = arith.subf %0, %1 : vector<24x1024xf32>
    %3 = tpu.iota {dimensions = array<i32: 0>} : vector<24x1024xi32>
    %c24_i32 = arith.constant 24 : i32
    %4 = arith.muli %arg0, %c24_i32 : i32
    %5 = vector.broadcast %4 : i32 to vector<24x1024xi32>
    %6 = arith.addi %3, %5 : vector<24x1024xi32>
    %c48_i32 = arith.constant 48 : i32
    %7 = vector.broadcast %c48_i32 : i32 to vector<24x1024xi32>
    %8 = arith.cmpi slt, %6, %7 : vector<24x1024xi32>
    %cst = arith.constant 0.000000e+00 : f32
    %9 = vector.broadcast %cst : f32 to vector<24x1024xf32>
    %10 = arith.select %8, %2, %9 : vector<24x1024xi1>, vector<24x1024xf32>
    %11 = arith.mulf %10, %10 : vector<24x1024xf32>
    %cst_3 = arith.constant dense<0.000000e+00> : vector<1024xf32>
    %12 = vector.multi_reduction <add>, %11, %cst_3 [0] : vector<24x1024xf32> to vector<1024xf32>
    %13 = vector.shape_cast %12 : vector<1024xf32> to vector<1x1024xf32>
    %14 = vector.shape_cast %13 : vector<1x1024xf32> to vector<1x1x1024xf32>
    %c0_4 = arith.constant 0 : index
    %c0_5 = arith.constant 0 : index
    %c0_6 = arith.constant 0 : index
    %15 = vector.load %arg3[%c0_4, %c0_5, %c0_6] : memref<1x1x1024xf32, #tpu.memory_space<vmem>>, vector<1x1x1024xf32>
    tpu.vector_store %arg3[%c0_4, %c0_5, %c0_6], %14 {strides = array<i32>} : memref<1x1x1024xf32, #tpu.memory_space<vmem>>, vector<1x1x1024xf32>,
    return
  }
  func.func @transform_0(%arg0: i32) -> (i32, i32) {
    %c0_i32 = arith.constant 0 : i32
    %c0_i32_0 = arith.constant 0 : i32
    return %arg0, %c0_i32 : i32, i32
  }
  func.func @transform_1(%arg0: i32) -> (i32, i32) {
    %c0_i32 = arith.constant 0 : i32
    %c0_i32_0 = arith.constant 0 : i32
    return %arg0, %c0_i32 : i32, i32
  }
  func.func @transform_2(%arg0: i32) -> (i32, i32, i32) {
    %c0_i32 = arith.constant 0 : i32
    %c0_i32_0 = arith.constant 0 : i32
    %c0_i32_1 = arith.constant 0 : i32
    return %arg0, %c0_i32, %c0_i32_0 : i32, i32, i32
  }
}

</mosaic_0001>

<bundles_post_ra>
// kernel: tpu_custom_call.1
= control target key start
LH: loop header
LB: loop body
LE: loop exit
PB: predicated region body
PF: predicated region fallthrough
CT: control target
= control target key end

     0   :  { %7 = vsyncpa [#allocation3], 0  ;;  %s1191_s0 = inlined_call_operand.hbm [shape: f32[48,1024], index: 0, kind: input, shape index: {}]   ;;  %s1192_s1 = inlined_call_operand.hbm [shape: f32[48,1024], index: 1, kind: input, shape index: {}]   ;;  %s1193_s2 = inlined_call_operand.hbm [shape: f32[2,1,1024], index: 2, kind: output, shape index: {}]  }
   0x1   :  { %9 = vsyncpa [#allocation3 + $0x1], 0 }
   0x2   :  { %10 = vsyncpa [#allocation6], 0 }
   0x3   :  { %12 = vsyncpa [#allocation6 + $0x1], 0 }
   0x4   :  { %13 = vsyncpa [#allocation4], 0 }
   0x5   :  { %15 = vsyncpa [#allocation4 + $0x1], 0  ;;  %s800_s9 = smov 0   ;;  %s802_s10 = smov 0  }
   0x6   :  { %s804_s11 = smov 0   ;;  %s806_s12 = smov 0  }
   0x7 LB: > { %s821_s13 = sadd.s32 4294967295, %s777_s12   ;;  %s569_s14 = sadd.s32 4294967294, %s777_s12   ;;  %s777_s12 = sphi %s806_s12, %s1208_s12   ;;  %s773_s11 = sphi %s804_s11, %s1207_s11   ;;  %s769_s10 = sphi %s802_s10, %s1206_s10   ;;  %s765_s9 = sphi %s800_s9, %s1205_s9  }
   0x8   : > { %s825_s15 = sadd.s32 1, %s777_s12   ;;  %s28_s16 = sadd.s32 1, %s773_s11 }
   0x9   : > { %s25_s17 = ssub.s32 %s777_s12, %s825_s15  ;;  %p35_p0 = scmp.ne.s32.totalorder %s773_s11, %s769_s10 }
   0xa   : > { %p26_p1 = scmp.eq.s32.totalorder %s25_s17, 0  ;;  %p36_p2 = scmp.eq.s32.totalorder %s777_s12, 0 }
   0xb   : > { %p41_p3 = scmp.ne.s32.totalorder %s769_s10, %s765_s9  ;;  %p42_p4 = scmp.eq.s32.totalorder %s821_s13, 0 }
   0xc   : > { %s837_s18 = scalar_select %p26_p1, %s773_s11, %s28_s16  }
   0xd   : > { %p37_p5 = por %p36_p2, %p35_p0  ;;  %p839_p6 = por %p42_p4, %p41_p3 }
   0xe   : > { %p91_p7 = scmp.eq.s32.totalorder %s821_s13, 1  ;;  %p97_p8 = scmp.eq.s32.totalorder %s569_s14, 1 }
   0xf   : > { %s1196_s19 = scalar_select %p839_p6, 1, 0 }
  0x10   : > { %p610_p10 = scmp.lt.s32.totalorder %s777_s12, 2  ;;  %p846_p11 = por %p91_p7, %p35_p0 }
  0x11   : > { %p850_p12 = por %p97_p8, %p41_p3  ;;  %s855_s22 = sand.u32 1, %s773_s11  }
  0x12   : > { %s1197_s20 = scalar_select %p846_p11, 1, 0 }
  0x13   : > { %s1198_s21 = scalar_select %p850_p12, 1, 0 }
  0x14   : > { %s588_s23 = smul.u32 3072, %s777_s12  ;;  %p866_p13 = pnand %p610_p10, %p37_p5 }
  0x15   : > { %s590_s24 = smul.u32 192, %s855_s22  ;;  %s118_s3 = scalar_lea.sflag [#allocation3], %s855_s22 }
  0x16   : > { %s864_s27 = scalar_lea.hbm %s1191_s0, %s588_s23  ;;  %p649_p1 = pneg %p866_p13 }
  0x17   : > { %s121_s29 = scalar_lea.vmem [#allocation2], %s590_s24  ;;  %s647_s4 = scalar_lea.hbm %s864_s27, 3072 }
  0x18   : > { %s129_s30 = sshll.u32 %s121_s29, 4  ;;  %p648_p0 = scmp.ne.s32.totalorder %s864_s27, %s647_s4  ;;  %s872_s30 = int_to_ptr.vmem [resolvable:$true] %s129_s30 }
  0x19   : > { %s652_s7 = scalar_lea.hbm %s1191_s0, 6144  ;;  %p653_p4 = scmp.lt.u32.totalorder %s864_s27, %s1191_s0 }
  0x1a   : > { %p650_p2 = pnand %p649_p1, %p648_p0  ;;  %p654_p5 = scmp.lt.u32.totalorder %s652_s7, %s647_s4 }
  0x1b   : > { %p656_p8 = scmp.lt.u32.totalorder %s647_s4, %s864_s27 }
  0x1c   : > { %p651_p3 = pneg %p650_p2  ;;  %p655_p7 = por %p654_p5, %p653_p4 }
  0x1e   : > { %p657_p10 = por %p656_p8, %p655_p7 }
  0x20   : > { %p658_p9 = pnand %p657_p10, %p651_p3 }
  0x22   : > { %661 = shalt.err (!%p658_p9)
}
  0x23   : > { %s662_s16 = scalar_lea.vmem %s872_s30, 3072  ;;  %s779_s17 = smov [#allocation2]  }
  0x24   : > { %p663_p0 = scmp.ne.s32.totalorder %s872_s30, %s662_s16  ;;  %s667_s25 = sshll.u32 %s779_s17, 4  ;;  %s668_s25 = int_to_ptr.vmem [resolvable:$false] %s667_s25 }
  0x25   : > { %s669_s26 = scalar_lea.vmem %s668_s25, 6144  ;;  %p670_p11 = scmp.lt.s32.totalorder %s872_s30, %s668_s25 }
  0x26   : > { %p665_p2 = pnand %p663_p0, %p649_p1  ;;  %p671_p4 = scmp.lt.s32.totalorder %s669_s26, %s662_s16 }
  0x28   : > { %p666_p12 = pneg %p665_p2  ;;  %p672_p5 = por %p671_p4, %p670_p11 }
  0x2a   : > { %p673_p7 = pnand %p672_p5, %p666_p12 }
  0x2c   : > { %676 = shalt.err (!%p673_p7)
}
  0x2d   : > { %s780_s29 = smov 1024   ;;  %s781_s4 = smov 64  }
  0x2e   : > { %602 = dma.hbm_to_vmem [thread:$0]  (!%p866_p13), %s864_s27, 3072, %s872_s30, %s118_s3, %s780_s29, %s780_s29, %s781_s4  }
  0x2f   : > { %p576_p9 = scmp.ge.s32.totalorder %s777_s12, 1  ;;  %p159_p11 = scmp.lt.s32.totalorder %s777_s12, 3 }
  0x30   : > { %s916_s8 = scalar_lea.hbm %s1192_s1, %s588_s23  ;;  %s143_s14 = scalar_lea.vmem [#allocation5], %s590_s24 }
  0x31   : > { %p907_p12 = pnand %p576_p9, %p159_p11  ;;  %s151_s16 = sshll.u32 %s143_s14, 4  ;;  %s920_s16 = int_to_ptr.vmem [resolvable:$true] %s151_s16 }
  0x32   : > { %s140_s27 = scalar_lea.sflag [#allocation6], %s855_s22  ;;  %s677_s30 = scalar_lea.hbm %s916_s8, 3072 }
  0x33   : > { %p678_p3 = scmp.ne.s32.totalorder %s916_s8, %s677_s30  ;;  %s682_s23 = scalar_lea.hbm %s1192_s1, 6144 }
  0x34   : > { %p683_p0 = scmp.lt.u32.totalorder %s916_s8, %s1192_s1  ;;  %p684_p2 = scmp.lt.u32.totalorder %s682_s23, %s677_s30 }
  0x35   : > { %p680_p8 = pnand %p678_p3, %p649_p1  ;;  %p686_p5 = scmp.lt.u32.totalorder %s677_s30, %s916_s8 }
  0x36   : > { %p685_p4 = por %p684_p2, %p683_p0 }
  0x37   : > { %p681_p10 = pneg %p680_p8 }
  0x38   : > { %p687_p7 = por %p686_p5, %p685_p4 }
  0x3a   : > { %p688_p9 = pnand %p687_p7, %p681_p10 }
  0x3c   : > { %691 = shalt.err (!%p688_p9)
}
  0x3d   : > { %s692_s24 = scalar_lea.vmem %s920_s16, 3072  ;;  %s782_s6 = smov [#allocation5]  }
  0x3e   : > { %p693_p11 = scmp.ne.s32.totalorder %s920_s16, %s692_s24  ;;  %s697_s7 = sshll.u32 %s782_s6, 4  ;;  %s698_s7 = int_to_ptr.vmem [resolvable:$false] %s697_s7 }
  0x3f   : > { %s699_s14 = scalar_lea.vmem %s698_s7, 6144  ;;  %p700_p6 = scmp.lt.s32.totalorder %s920_s16, %s698_s7 }
  0x40   : > { %p695_p3 = pnand %p693_p11, %p649_p1  ;;  %p701_p0 = scmp.lt.s32.totalorder %s699_s14, %s692_s24 }
  0x42   : > { %p696_p8 = pneg %p695_p3  ;;  %p702_p2 = por %p701_p0, %p700_p6 }
  0x44   : > { %p703_p4 = pnand %p702_p2, %p696_p8 }
  0x46   : > { %706 = shalt.err (!%p703_p4)
}
  0x47   : > { %605 = dma.hbm_to_vmem [thread:$0]  (!%p866_p13), %s916_s8, 3072, %s920_s16, %s140_s27, %s780_s29, %s780_s29, %s781_s4  }
  0x48   : > { %163 = sbr.rel (%p907_p12) target bundleno = 150 (0x96), region = 28  ;;  %s954_s30 = sand.u32 (!%p907_p12), 1, %s769_s10  }
  0x49   : > { %s592_s3 = smul.u32 (!%p907_p12), 192, %s954_s30  ;;  %s166_s17 = scalar_lea.sflag (!%p907_p12), [#allocation3], %s954_s30 }
  0x4a   : > { %p1201_p6 = scmp.ne.s32.totalorder (!%p907_p12), %s1196_s19, 0 }
  0x4b   : > { %s958_s28 = scalar_lea.vmem (!%p907_p12), [#allocation2], %s592_s3 }
  0x4f   : > { %752 = dma.done.wait (%p1201_p6), %s166_s17, 3072  }
  0x50   : > { %754 = vsyncadd (%p1201_p6), %s166_s17, 4294964224  ;;  %s175_s22 = scalar_lea.sflag [#allocation6], %s954_s30  ;;  %s965_s29 = scalar_lea.vmem [#allocation5], %s592_s3 }
  0x51   : > { %756 = dma.done.wait (%p1201_p6), %s175_s22, 3072  }
  0x52   : > { %758 = vsyncadd (%p1201_p6), %s175_s22, 4294964224  ;;  %v278_v0 = vlaneseq  ;;  %s282_s4 = smul.u32 24, %s821_s13  ;;  %v783_v2 = vmov 1966171168   ;;  %v206_v7 = vld [vmem:[%s958_s28] sm:$0xff]  ;;  %v207_v8 = vld [vmem:[%s958_s28 + $0x8] sm:$0xff] }
  0x53   : > { %v415_v3 = vunpack.c.l.s4 %v783_v2  ;;  %v975_v9 = vld [vmem:[%s958_s28 + $0x10] sm:$0xff]  ;;  %v980_v12 = vld [vmem:[%s958_s28 + $0x18] sm:$0xff]  ;;  %v983_v13 = vld [vmem:[%s958_s28 + $0x20] sm:$0xff]  ;;  %s577_s19 = sshll.u32 %s954_s30, 3  ;;  %s587_s5 = sshll.u32 %s821_s13, 7 }
  0x54   : > { %v279_v1 = vshrl.u32 %v278_v0, 7  ;;  %v283_v5 = vstv %s282_s4  ;;  %v986_v14 = vld [vmem:[%s958_s28 + $0x28] sm:$0xff]  ;;  %v991_v16 = vld [vmem:[%s958_s28 + $0x30] sm:$0xff]  ;;  %v994_v17 = vld [vmem:[%s958_s28 + $0x38] sm:$0xff]  ;;  %s203_s8 = scalar_lea.vmem [#allocation7], %s577_s19  ;;  %s1147_s25 = scalar_lea.hbm %s1193_s2, %s587_s5 }
  0x55   : > { %v416_v11 = vunpack.c.0.s8 %v415_v3  ;;  %v997_v18 = vld [vmem:[%s958_s28 + $0x40] sm:$0xff]  ;;  %v1002_v20 = vld [vmem:[%s958_s28 + $0x48] sm:$0xff]  ;;  %v1005_v21 = vld [vmem:[%s958_s28 + $0x50] sm:$0xff]  ;;  %s476_s16 = sshll.u32 %s203_s8, 4  ;;  %s462_s26 = scalar_lea.sflag [#allocation4], %s954_s30  ;;  %s1149_s16 = int_to_ptr.vmem [resolvable:$true] %s476_s16 }
  0x56   : > { %v280_v4 = vadd.s32 8, %v279_v1  ;;  %v281_v6 = vadd.s32 16, %v279_v1  ;;  %v977_v10 = vadd.s32 %v283_v5, %v279_v1  ;;  %v1008_v22 = vld [vmem:[%s958_s28 + $0x58] sm:$0xff]  ;;  %v1011_v23 = vld [vmem:[%s958_s28 + $0x60] sm:$0xff]  ;;  %v1014_v24 = vld [vmem:[%s958_s28 + $0x68] sm:$0xff]  ;;  %s707_s24 = scalar_lea.vmem %s1149_s16, 128 }
  0x57   : > { %v1017_v25 = vld [vmem:[%s958_s28 + $0x70] sm:$0xff]  ;;  %v230_v26 = vld [vmem:[%s965_s29] sm:$0xff]  ;;  %v231_v27 = vld [vmem:[%s965_s29 + $0x8] sm:$0xff]  ;;  %v1023_v29 = vsub.s32 %v416_v11, %v279_v1  ;;  %p708_p13 = scmp.ne.s32.totalorder %s1149_s16, %s707_s24  ;;  %p1202_p1 = scmp.ne.s32.totalorder %s1197_s20, 0 }
  0x58   : > { %v988_v15 = vadd.s32 %v283_v5, %v280_v4  ;;  %v999_v19 = vadd.s32 %v283_v5, %v281_v6  ;;  %v232_v28 = vld [vmem:[%s965_s29 + $0x10] sm:$0xff]  ;;  %vm287_vm0 = vcmp.lt.s32.totalorder %v977_v10, 48  ;;  %v1026_v30 = vld [vmem:[%s958_s28 + $0x78] sm:$0xff]  ;;  %v1029_v31 = vld [vmem:[%s958_s28 + $0x80] sm:$0xff]  ;;  %v254_v36 = vsub.f32 %v206_v7, %v230_v26  ;;  %s784_s13 = smov [#allocation7]  }
  0x59   : > { %v1032_v32 = vld [vmem:[%s958_s28 + $0x88] sm:$0xff]  ;;  %v233_v33 = vld [vmem:[%s965_s29 + $0x18] sm:$0xff]  ;;  %v234_v34 = vld [vmem:[%s965_s29 + $0x20] sm:$0xff]  ;;  %v255_v37 = vsub.f32 %v207_v8, %v231_v27  ;;  %v256_v38 = vsub.f32 %v975_v9, %v232_v28  ;;  %p709_p12 = pnand %p708_p13, %p1202_p1  ;;  %s711_s6 = sshll.u32 %s784_s13, 4  ;;  %s712_s6 = int_to_ptr.vmem [resolvable:$false] %s711_s6 }
  0x5a   : > { %v235_v35 = vld [vmem:[%s965_s29 + $0x28] sm:$0xff]  ;;  %vm288_vm1 = vcmp.lt.s32.totalorder %v988_v15, 48  ;;  %v1040_v39 = vld [vmem:[%s958_s28 + $0x90] sm:$0xff]  ;;  %v1043_v40 = vld [vmem:[%s958_s28 + $0x98] sm:$0xff]  ;;  %v257_v45 = vsub.f32 %v980_v12, %v233_v33  ;;  %v258_v46 = vsub.f32 %v983_v13, %v234_v34  ;;  %vm289_vm2 = vcmp.lt.s32.totalorder %v999_v19, 48  ;;  %s713_s7 = scalar_lea.vmem %s712_s6, 256  ;;  %p714_p5 = scmp.lt.s32.totalorder %s1149_s16, %s712_s6 }
  0x5b   : > { %v1046_v41 = vld [vmem:[%s958_s28 + $0xa0] sm:$0xff]  ;;  %v236_v42 = vld [vmem:[%s965_s29 + $0x30] sm:$0xff]  ;;  %v237_v43 = vld [vmem:[%s965_s29 + $0x38] sm:$0xff]  ;;  %v259_v47 = vsub.f32 %v986_v14, %v235_v35  ;;  %v290_v57 = vsel %vm287_vm0, %v254_v36, 0.0  ;;  %v291_v0 = vsel %vm287_vm0, %v255_v37, 0.0  ;;  %v292_v7 = vsel %vm287_vm0, %v256_v38, 0.0  ;;  %p710_p10 = pneg %p709_p12  ;;  %p715_p7 = scmp.lt.s32.totalorder %s713_s7, %s707_s24 }
  0x5c   : > { %v238_v44 = vld [vmem:[%s965_s29 + $0x40] sm:$0xff]  ;;  %v227_v48 = vld [vmem:[%s958_s28 + $0xa8] sm:$0xff]  ;;  %v228_v49 = vld [vmem:[%s958_s28 + $0xb0] sm:$0xff]  ;;  %v260_v54 = vsub.f32 %v991_v16, %v236_v42  ;;  %v261_v55 = vsub.f32 %v994_v17, %v237_v43  ;;  %v293_v16 = vsel %vm287_vm0, %v257_v45, 0.0 }
  0x5d   : > { %v229_v50 = vld [vmem:[%s958_s28 + $0xb8] sm:$0xff]  ;;  %v239_v51 = vld [vmem:[%s965_s29 + $0x48] sm:$0xff]  ;;  %v240_v52 = vld [vmem:[%s965_s29 + $0x50] sm:$0xff]  ;;  %v262_v56 = vsub.f32 %v997_v18, %v238_v44  ;;  %v295_v28 = vsel %vm287_vm0, %v259_v47, 0.0  ;;  %v315_v47 = vmul.f32 %v291_v0, %v291_v0  ;;  %p716_p9 = por %p715_p7, %p714_p5 }
  0x5e   : > { %v241_v53 = vld [vmem:[%s965_s29 + $0x58] sm:$0xff]  ;;  %v242_v58 = vld [vmem:[%s965_s29 + $0x60] sm:$0xff]  ;;  %v243_v59 = vld [vmem:[%s965_s29 + $0x68] sm:$0xff]  ;;  %v263_v61 = vsub.f32 %v1002_v20, %v239_v51  ;;  %v264_v62 = vsub.f32 %v1005_v21, %v240_v52  ;;  %v319_v51 = vmul.f32 %v295_v28, %v295_v28 }
  0x5f   : > { %v244_v60 = vld [vmem:[%s965_s29 + $0x70] sm:$0xff]  ;;  %v265_v63 = vsub.f32 %v1008_v22, %v241_v53  ;;  %v245_v1 = vld [vmem:[%s965_s29 + $0x78] sm:$0xff]  ;;  %v246_v2 = vld [vmem:[%s965_s29 + $0x80] sm:$0xff]  ;;  %v266_v4 = vsub.f32 %v1011_v23, %v242_v58  ;;  %v267_v5 = vsub.f32 %v1014_v24, %v243_v59  ;;  %v294_v24 = vsel %vm287_vm0, %v258_v46, 0.0  ;;  %p717_p11 = pnand %p716_p9, %p710_p10 }
  0x60   : > { %v247_v3 = vld [vmem:[%s965_s29 + $0x88] sm:$0xff]  ;;  %v268_v6 = vsub.f32 %v1017_v25, %v244_v60  ;;  %v248_v8 = vld [vmem:[%s965_s29 + $0x90] sm:$0xff]  ;;  %v249_v9 = vld [vmem:[%s965_s29 + $0x98] sm:$0xff]  ;;  %v269_v12 = vsub.f32 %v1026_v30, %v245_v1  ;;  %v270_v13 = vsub.f32 %v1029_v31, %v246_v2  ;;  %v296_v30 = vsel %vm287_vm0, %v260_v54, 0.0 }
  0x61   : > { %v250_v11 = vld [vmem:[%s965_s29 + $0xa0] sm:$0xff]  ;;  %v271_v14 = vsub.f32 %v1032_v32, %v247_v3  ;;  %v251_v17 = vld [vmem:[%s965_s29 + $0xa8] sm:$0xff]  ;;  %v252_v18 = vld [vmem:[%s965_s29 + $0xb0] sm:$0xff]  ;;  %v272_v21 = vsub.f32 %v1040_v39, %v248_v8  ;;  %v273_v22 = vsub.f32 %v1043_v40, %v249_v9  ;;  %v297_v31 = vsel %vm287_vm0, %v261_v55, 0.0 }
  0x62   : > { %v253_v20 = vld [vmem:[%s965_s29 + $0xb8] sm:$0xff]  ;;  %v274_v23 = vsub.f32 %v1046_v41, %v250_v11  ;;  %v275_v25 = vsub.f32 %v227_v48, %v251_v17  ;;  %v276_v26 = vsub.f32 %v228_v49, %v252_v18  ;;  %v298_v32 = vsel %vm288_vm1, %v262_v56, 0.0 }
  0x63   : > { %v277_v27 = vsub.f32 %v229_v50, %v253_v20  ;;  %v299_v33 = vsel %vm288_vm1, %v263_v61, 0.0  ;;  %v300_v34 = vsel %vm288_vm1, %v264_v62, 0.0  ;;  %v301_v35 = vsel %vm288_vm1, %v265_v63, 0.0 }
  0x64   : > { %v302_v36 = vsel %vm288_vm1, %v266_v4, 0.0  ;;  %v303_v37 = vsel %vm288_vm1, %v267_v5, 0.0  ;;  %v304_v10 = vsel %vm288_vm1, %v268_v6, 0.0  ;;  %v305_v38 = vsel %vm288_vm1, %v269_v12, 0.0 }
  0x65   : > { %v306_v39 = vsel %vm289_vm2, %v270_v13, 0.0  ;;  %v307_v40 = vsel %vm289_vm2, %v271_v14, 0.0  ;;  %v308_v41 = vsel %vm289_vm2, %v272_v21, 0.0  ;;  %v309_v42 = vsel %vm289_vm2, %v273_v22, 0.0 }
  0x66   : > { %v310_v43 = vsel %vm289_vm2, %v274_v23, 0.0  ;;  %v311_v44 = vsel %vm289_vm2, %v275_v25, 0.0  ;;  %v312_v15 = vsel %vm289_vm2, %v276_v26, 0.0  ;;  %v313_v45 = vsel %vm289_vm2, %v277_v27, 0.0 }
  0x67   : > { %v314_v46 = vmul.f32 %v290_v57, %v290_v57  ;;  %v316_v48 = vmul.f32 %v292_v7, %v292_v7  ;;  %v317_v49 = vmul.f32 %v293_v16, %v293_v16  ;;  %v318_v50 = vmul.f32 %v294_v24, %v294_v24 }
  0x68   : > { %v320_v52 = vmul.f32 %v296_v30, %v296_v30  ;;  %v321_v53 = vmul.f32 %v297_v31, %v297_v31  ;;  %v322_v54 = vmul.f32 %v298_v32, %v298_v32  ;;  %v323_v55 = vmul.f32 %v299_v33, %v299_v33 }
  0x69   : > { %v324_v56 = vmul.f32 %v300_v34, %v300_v34  ;;  %v325_v58 = vmul.f32 %v301_v35, %v301_v35  ;;  %v326_v59 = vmul.f32 %v302_v36, %v302_v36  ;;  %v327_v60 = vmul.f32 %v303_v37, %v303_v37 }
  0x6a   : > { %v328_v61 = vmul.f32 %v304_v10, %v304_v10  ;;  %v329_v62 = vmul.f32 %v305_v38, %v305_v38  ;;  %v330_v63 = vmul.f32 %v306_v39, %v306_v39  ;;  %v331_v1 = vmul.f32 %v307_v40, %v307_v40 }
  0x6b   : > { %v332_v19 = vmul.f32 %v308_v41, %v308_v41  ;;  %v333_v2 = vmul.f32 %v309_v42, %v309_v42  ;;  %v334_v57 = vmul.f32 %v310_v43, %v310_v43  ;;  %v335_v0 = vmul.f32 %v311_v44, %v311_v44 }
  0x6c   : > { %v336_v3 = vmul.f32 %v312_v15, %v312_v15  ;;  %v337_v4 = vmul.f32 %v313_v45, %v313_v45  ;;  %v338_v5 = vadd.f32 %v322_v54, %v314_v46  ;;  %v346_v6 = vadd.f32 %v323_v55, %v315_v47 }
  0x6d   : > { %v354_v7 = vadd.f32 %v324_v56, %v316_v48  ;;  %v362_v8 = vadd.f32 %v325_v58, %v317_v49  ;;  %v370_v9 = vadd.f32 %v326_v59, %v318_v50  ;;  %v378_v11 = vadd.f32 %v327_v60, %v319_v51 }
  0x6e   : > { %v339_v12 = vadd.f32 %v338_v5, %v330_v63  ;;  %v347_v13 = vadd.f32 %v346_v6, %v331_v1  ;;  %v386_v14 = vadd.f32 %v328_v61, %v320_v52  ;;  %v394_v16 = vadd.f32 %v329_v62, %v321_v53 }
  0x6f   : > { %v355_v17 = vadd.f32 %v354_v7, %v332_v19  ;;  %v363_v18 = vadd.f32 %v362_v8, %v333_v2  ;;  %v371_v20 = vadd.f32 %v370_v9, %v334_v57  ;;  %v379_v21 = vadd.f32 %v378_v11, %v335_v0 }
  0x70   : > { %v340_v22 = vrot.slane %v339_v12, 4  ;;  %v348_v23 = vrot.slane %v347_v13, 4  ;;  %v387_v24 = vadd.f32 %v386_v14, %v336_v3  ;;  %v395_v25 = vadd.f32 %v394_v16, %v337_v4 }
  0x71   : > { %v356_v26 = vrot.slane %v355_v17, 4  ;;  %v364_v27 = vrot.slane %v363_v18, 4  ;;  %v372_v28 = vrot.slane %v371_v20, 4  ;;  %v380_v30 = vrot.slane %v379_v21, 4 }
  0x72   : > { %v341_v31 = vadd.f32 %v340_v22, %v339_v12  ;;  %v349_v32 = vadd.f32 %v348_v23, %v347_v13  ;;  %v388_v33 = vrot.slane %v387_v24, 4  ;;  %v396_v34 = vrot.slane %v395_v25, 4 }
  0x73   : > { %v357_v35 = vadd.f32 %v356_v26, %v355_v17  ;;  %v365_v36 = vadd.f32 %v364_v27, %v363_v18  ;;  %v373_v37 = vadd.f32 %v372_v28, %v371_v20  ;;  %v381_v10 = vadd.f32 %v380_v30, %v379_v21 }
  0x74   : > { %v342_v38 = vrot.slane %v341_v31, 2  ;;  %v350_v39 = vrot.slane %v349_v32, 2  ;;  %v389_v40 = vadd.f32 %v388_v33, %v387_v24  ;;  %v397_v41 = vadd.f32 %v396_v34, %v395_v25 }
  0x75   : > { %v358_v42 = vrot.slane %v357_v35, 2  ;;  %v366_v43 = vrot.slane %v365_v36, 2  ;;  %v374_v44 = vrot.slane %v373_v37, 2  ;;  %v382_v15 = vrot.slane %v381_v10, 2 }
  0x76   : > { %v343_v45 = vadd.f32 %v342_v38, %v341_v31  ;;  %v351_v46 = vadd.f32 %v350_v39, %v349_v32  ;;  %v390_v47 = vrot.slane %v389_v40, 2  ;;  %v398_v48 = vrot.slane %v397_v41, 2 }
  0x77   : > { %v359_v49 = vadd.f32 %v358_v42, %v357_v35  ;;  %v367_v50 = vadd.f32 %v366_v43, %v365_v36  ;;  %v375_v51 = vadd.f32 %v374_v44, %v373_v37  ;;  %v383_v52 = vadd.f32 %v382_v15, %v381_v10 }
  0x78   : > { %v344_v53 = vrot.slane %v343_v45, 1  ;;  %v352_v54 = vrot.slane %v351_v46, 1  ;;  %v391_v55 = vadd.f32 %v390_v47, %v389_v40  ;;  %v399_v56 = vadd.f32 %v398_v48, %v397_v41 }
  0x79   : > { %v360_v58 = vrot.slane %v359_v49, 1  ;;  %v368_v59 = vrot.slane %v367_v50, 1  ;;  %v376_v60 = vrot.slane %v375_v51, 1  ;;  %v384_v61 = vrot.slane %v383_v52, 1 }
  0x7a   : > { %v345_v62 = vadd.f32 %v344_v53, %v343_v45  ;;  %v353_v63 = vadd.f32 %v352_v54, %v351_v46  ;;  %v392_v1 = vrot.slane %v391_v55, 1  ;;  %v400_v19 = vrot.slane %v399_v56, 1 }
  0x7b   : > { %v361_v2 = vadd.f32 %v360_v58, %v359_v49  ;;  %v369_v57 = vadd.f32 %v368_v59, %v367_v50  ;;  %v377_v0 = vadd.f32 %v376_v60, %v375_v51  ;;  %v385_v3 = vadd.f32 %v384_v61, %v383_v52 }
  0x7c   : > { %v393_v4 = vadd.f32 %v392_v1, %v391_v55  ;;  %v401_v5 = vadd.f32 %v400_v19, %v399_v56  ;;  %v410_v6 = vcombine.low %v345_v62, %v353_v63 }
  0x7d   : > { %v411_v7 = vcombine.low %v361_v2, %v369_v57  ;;  %v412_v8 = vcombine.low %v377_v0, %v385_v3 }
  0x7e   : > { %v413_v9 = vcombine.low %v393_v4, %v401_v5  ;;  %v420_v11 = vrot.slane %v410_v6, %v1023_v29 }
  0x7f   : > { %v427_v12 = vrot.slane %v411_v7, %v1023_v29  ;;  %v434_v13 = vrot.slane %v412_v8, %v1023_v29 }
  0x80   : > { %v441_v14 = vrot.slane %v413_v9, %v1023_v29 }
  0x81   : > { %v442_v16 = vcombine.low %v420_v11, %v427_v12 }
  0x82   : > { %v443_v17 = vcombine.low %v434_v13, %v441_v14 }
  0x83   : > { %v450_v18 = vrot.slane %v442_v16, %v1023_v29 }
  0x84   : > { %v457_v20 = vrot.slane %v443_v17, %v1023_v29 }
  0x86   : > { %v458_v21 = vcombine.low %v450_v18, %v457_v20 }
  0x88   : > { %460 = vst [vmem:[%s203_s8] sm:$0xff] %v458_v21 }
  0x89   : > { %720 = shalt.err (!%p717_p11)
}
  0x8a   : > { %s721_s14 = scalar_lea.hbm %s1147_s25, 128  ;;  %s725_s17 = scalar_lea.hbm %s1193_s2, 256 }
  0x8b   : > { %p722_p3 = scmp.ne.s32.totalorder %s1147_s25, %s721_s14  ;;  %p726_p2 = scmp.lt.u32.totalorder %s1147_s25, %s1193_s2 }
  0x8c   : > { %p727_p4 = scmp.lt.u32.totalorder %s725_s17, %s721_s14  ;;  %p729_p13 = scmp.lt.u32.totalorder %s721_s14, %s1147_s25 }
  0x8d   : > { %p723_p8 = pnand %p722_p3, %p1202_p1 }
  0x8e   : > { %p728_p6 = por %p727_p4, %p726_p2 }
  0x8f   : > { %p724_p0 = pneg %p723_p8 }
  0x90   : > { %p730_p12 = por %p729_p13, %p728_p6 }
  0x92   : > { %p731_p10 = pnand %p730_p12, %p724_p0 }
  0x94   : > { %734 = shalt.err (!%p731_p10)
}
  0x95   : > { %597 = dma.vmem_to_hbm [thread:$0]  (%p1202_p1), %s1149_s16, 128, %s1147_s25, %s462_s26  }
  0x96 PF: > { %s488_s29 = sand.u32 1, %s765_s9   ;;  %p1203_p5 = scmp.ne.s32.totalorder %s1198_s21, 0 }
  0x97   : > { %p1204_p7 = scmp.ge.s32.totalorder %s777_s12, 2  ;;  %s489_s4 = scalar_lea.sflag [#allocation4], %s488_s29 }
  0x99   : > { %p607_p9 = pnand %p1204_p7, %p1203_p5 }
  0x9b   : > { %760 = dma.done.wait (!%p607_p9), %s489_s4, 128  }
  0x9c   : > { %762 = vsyncadd (!%p607_p9), %s489_s4, 4294967168  ;;  %p18_p11 = scmp.ge.s32.totalorder %s825_s15, 4   ;;  %s1205_s9 = smov %s769_s10 }
  0x9d   : > { %s1206_s10 = smov %s773_s11  ;;  %s1207_s11 = smov %s837_s18 }
  0x9e   : > { %s1208_s12 = smov %s825_s15  ;;  %20 = sbr.rel (!%p18_p11) target bundleno = 7 (0x7), region = 86 }
  0xa5   :  { %494 = vsyncpa [#allocation3], 1 }
  0xa6   :  { %496 = vsyncpa [#allocation3 + $0x1], 1 }
  0xa7   :  { %497 = vsyncpa [#allocation6], 1 }
  0xa8   :  { %499 = vsyncpa [#allocation6 + $0x1], 1 }
  0xa9   :  { %500 = vsyncpa [#allocation4], 1 }
  0xaa   :  { %502 = vsyncpa [#allocation4 + $0x1], 1 }

</bundles_post_ra>
